<compile_context>
chip_gen: v6e
topology: v6e:2x2x1
jax: 0.10.0
libtpu: 0.0.40
codegen_flags: <defaults>
</compile_context>

<pallas_src>
import functools

import jax
import jax.numpy as jnp
from jax import lax
from jax.experimental import pallas as pl
from jax.experimental.pallas import tpu as pltpu

NEG_INF = -1e30
VMEM_LIMIT_BYTES = 32 * 1024 * 1024   # safe on v5e/v6e (128 MiB) and v7x (64 MiB)


def _pick_tile(n, preferred):
    """Largest tile <= preferred that evenly divides n."""
    t = min(n, preferred)
    while n % t:
        t -= 1
    return t


def _cparams(*semantics):
    return pltpu.CompilerParams(dimension_semantics=semantics,
                                vmem_limit_bytes=VMEM_LIMIT_BYTES)


# ------------------ fused RMSNorm + matmul (QKV proj, logits) ----------------

def _rmsnorm_matmul_kernel(x_ref, g_ref, w_ref, o_ref):
    x = x_ref[...]                                     # (tm, D) f32
    ms = jnp.mean(x * x, axis=-1, keepdims=True)
    xn = (x * lax.rsqrt(ms + 1e-6) * g_ref[...]).astype(jnp.bfloat16)
    o_ref[...] = jnp.dot(xn, w_ref[...],
                         preferred_element_type=jnp.float32).astype(o_ref.dtype)


def rmsnorm_matmul(x2d, gamma, w_bf16, out_dtype=jnp.bfloat16,
                   tm_pref=256, tn_pref=512):
    # The contraction dim (model dim D) is not tiled: the norm needs the full
    # row and D is the small model dim; rows and output columns are tiled.
    M, D = x2d.shape
    _, Nout = w_bf16.shape
    tm = _pick_tile(M, tm_pref)
    tn = _pick_tile(Nout, tn_pref)
    g = gamma.reshape(1, D).astype(jnp.float32)
    return pl.pallas_call(
        _rmsnorm_matmul_kernel,
        out_shape=jax.ShapeDtypeStruct((M, Nout), out_dtype),
        grid=(M // tm, Nout // tn),
        in_specs=[pl.BlockSpec((tm, D), lambda i, j: (i, 0)),
                  pl.BlockSpec((1, D), lambda i, j: (0, 0)),
                  pl.BlockSpec((D, tn), lambda i, j: (0, j))],
        out_specs=pl.BlockSpec((tm, tn), lambda i, j: (i, j)),
        compiler_params=_cparams("parallel", "parallel"),
    )(x2d, g, w_bf16)


# ------------------ fused RMSNorm + FF (W1 -> GELU -> W2) --------------------

def _ff_kernel(x_ref, g_ref, w1_ref, w2_ref, o_ref, acc_ref):
    hk = pl.program_id(1)

    @pl.when(hk == 0)
    def _():
        acc_ref[...] = jnp.zeros_like(acc_ref)

    # RMSNorm recomputed per hidden tile: negligible VPU cost vs. weight DMA.
    x = x_ref[...]
    ms = jnp.mean(x * x, axis=-1, keepdims=True)
    xn = (x * lax.rsqrt(ms + 1e-6) * g_ref[...]).astype(jnp.bfloat16)
    h = jnp.dot(xn, w1_ref[...], preferred_element_type=jnp.float32)
    h = jax.nn.gelu(h, approximate=True).astype(jnp.bfloat16)
    acc_ref[...] += jnp.dot(h, w2_ref[...], preferred_element_type=jnp.float32)

    @pl.when(hk == pl.num_programs(1) - 1)
    def _():
        o_ref[...] = acc_ref[...]


def feedforward(x2d, gamma, w1_bf16, w2_bf16, tm_pref=256, th_pref=512):
    M, D = x2d.shape
    _, Hdim = w1_bf16.shape
    tm = _pick_tile(M, tm_pref)
    th = _pick_tile(Hdim, th_pref)
    g = gamma.reshape(1, D).astype(jnp.float32)
    return pl.pallas_call(
        _ff_kernel,
        out_shape=jax.ShapeDtypeStruct((M, D), jnp.float32),
        grid=(M // tm, Hdim // th),
        in_specs=[pl.BlockSpec((tm, D), lambda i, k: (i, 0)),
                  pl.BlockSpec((1, D), lambda i, k: (0, 0)),
                  pl.BlockSpec((D, th), lambda i, k: (0, k)),
                  pl.BlockSpec((th, D), lambda i, k: (k, 0))],
        out_specs=pl.BlockSpec((tm, D), lambda i, k: (i, 0)),
        scratch_shapes=[pltpu.VMEM((tm, D), jnp.float32)],
        compiler_params=_cparams("parallel", "arbitrary"),
    )(x2d, g, w1_bf16, w2_bf16)


# ------------------ flash-style causal attention (+ fused wo) ----------------

def _causal_attn_kernel(q_ref, k_ref, v_ref, wo_ref, o_ref,
                        m_sc, l_sc, acc_sc, *, heads, dim_head, scale,
                        tq, tkv):
    qi = pl.program_id(1)
    ki = pl.program_id(2)

    @pl.when(ki == 0)
    def _():
        m_sc[...] = jnp.full_like(m_sc, NEG_INF)
        l_sc[...] = jnp.zeros_like(l_sc)
        acc_sc[...] = jnp.zeros_like(acc_sc)

    q_start = qi * tq
    k_start = ki * tkv

    @pl.when(k_start <= q_start + (tq - 1))          # skip fully-masked tiles
    def _():
        row = q_start + lax.broadcasted_iota(jnp.int32, (tq, tkv), 0)
        col = k_start + lax.broadcasted_iota(jnp.int32, (tq, tkv), 1)
        mask = col <= row
        for h in range(heads):                        # heads folded in lanes
            hs = h * dim_head
            q_h = q_ref[0, :, hs:hs + dim_head]       # (tq, Dh) bf16
            k_h = k_ref[0, :, hs:hs + dim_head]       # (tkv, Dh) bf16
            v_h = v_ref[0, :, hs:hs + dim_head]
            s = lax.dot_general(q_h, k_h, (((1,), (1,)), ((), ())),
                                preferred_element_type=jnp.float32) * scale
            s = jnp.where(mask, s, NEG_INF)
            m_prev = m_sc[h]
            m_new = jnp.maximum(m_prev, jnp.max(s, axis=-1, keepdims=True))
            alpha = jnp.exp(m_prev - m_new)
            p = jnp.exp(s - m_new)
            l_sc[h] = alpha * l_sc[h] + jnp.sum(p, axis=-1, keepdims=True)
            acc_sc[h] = alpha * acc_sc[h] + jnp.dot(
                p.astype(jnp.bfloat16), v_h, preferred_element_type=jnp.float32)
            m_sc[h] = m_new

    @pl.when(ki == pl.num_programs(2) - 1)
    def _():
        outs = [(acc_sc[h] * pl.reciprocal(l_sc[h], approx=True)
                 ).astype(jnp.bfloat16) for h in range(heads)]
        o_cat = jnp.concatenate(outs, axis=-1)        # (tq, H*Dh)
        o_ref[0] = jnp.dot(o_cat, wo_ref[...],        # fused output projection
                           preferred_element_type=jnp.float32)


def causal_attention(q, k, v, wo_bf16, *, heads, dim_head,
                     tq_pref=256, tkv_pref=256):
    B, N, inner = q.shape
    D = wo_bf16.shape[1]
    tq = _pick_tile(N, tq_pref)
    tkv = _pick_tile(N, tkv_pref)
    kern = functools.partial(_causal_attn_kernel, heads=heads,
                             dim_head=dim_head, scale=dim_head ** -0.5,
                             tq=tq, tkv=tkv)
    qspec = pl.BlockSpec((1, tq, inner), lambda b, i, j: (b, i, 0))
    kvspec = pl.BlockSpec((1, tkv, inner), lambda b, i, j: (b, j, 0))
    return pl.pallas_call(
        kern,
        out_shape=jax.ShapeDtypeStruct((B, N, D), jnp.float32),
        grid=(B, N // tq, N // tkv),
        in_specs=[qspec, kvspec, kvspec,
                  pl.BlockSpec((inner, D), lambda b, i, j: (0, 0))],
        out_specs=pl.BlockSpec((1, tq, D), lambda b, i, j: (b, i, 0)),
        scratch_shapes=[pltpu.VMEM((heads, tq, 1), jnp.float32),
                        pltpu.VMEM((heads, tq, 1), jnp.float32),
                        pltpu.VMEM((heads, tq, dim_head), jnp.float32)],
        compiler_params=_cparams("parallel", "parallel", "arbitrary"),
    )(q, k, v, wo_bf16)


# ------------- streamed two-simplicial attention (+ fused wo) ----------------

def _two_simplicial_kernel(q_ref, k1_ref, k2_ref, v1_ref, v2_ref, wo_ref,
                           o_ref, m_sc, l_sc, acc_sc, *,
                           heads, dim_head, scale, tq, tj, kv_len):
    qi = pl.program_id(1)
    ji = pl.program_id(2)

    @pl.when(ji == 0)
    def _():
        m_sc[...] = jnp.full_like(m_sc, NEG_INF)
        l_sc[...] = jnp.zeros_like(l_sc)
        acc_sc[...] = jnp.zeros_like(acc_sc)

    q_start = qi * tq
    j_start = ji * tj

    @pl.when(j_start <= q_start + (tq - 1))           # causal skip on j tiles
    def _():
        # masks: first key j <= i, second key k <= i
        i_on_jq = q_start + lax.broadcasted_iota(jnp.int32, (tj, tq), 1)
        j_on_jq = j_start + lax.broadcasted_iota(jnp.int32, (tj, tq), 0)
        mask_ji = j_on_jq <= i_on_jq                                 # (tj, tq)
        i_on_ik = q_start + lax.broadcasted_iota(jnp.int32, (tq, kv_len), 0)
        k_on_ik = lax.broadcasted_iota(jnp.int32, (tq, kv_len), 1)
        mask_ik = k_on_ik <= i_on_ik                                 # (tq, kv)
        for h in range(heads):
            hs = h * dim_head
            q_h = q_ref[0, :, hs:hs + dim_head].astype(jnp.float32)   # (tq,Dh)
            k1_h = k1_ref[0, :, hs:hs + dim_head].astype(jnp.float32)  # (tj,Dh)
            v1_h = v1_ref[0, :, hs:hs + dim_head].astype(jnp.float32)  # (tj,Dh)
            k2_h = k2_ref[0, :, hs:hs + dim_head]                      # (kv,Dh) bf16
            v2_h = v2_ref[0, :, hs:hs + dim_head]                      # (kv,Dh) bf16

            # logits[j,i,k] = sum_d q[i,d]*k1[j,d]*k2[k,d]  (one MXU matmul)
            qk1 = (k1_h[:, None, :] * q_h[None, :, :]).astype(jnp.bfloat16)
            s = lax.dot_general(qk1.reshape(tj * tq, dim_head), k2_h,
                                (((1,), (1,)), ((), ())),
                                preferred_element_type=jnp.float32)
            s = s.reshape(tj, tq, kv_len) * scale
            s = jnp.where(mask_ik[None, :, :], s, NEG_INF)
            s = jnp.where(mask_ji[:, :, None], s, NEG_INF)

            m_prev = m_sc[h]                                          # (tq,1)
            tile_max = jnp.max(jnp.max(s, axis=0), axis=-1, keepdims=True)
            m_new = jnp.maximum(m_prev, tile_max)
            alpha = jnp.exp(m_prev - m_new)
            p = jnp.exp(s - m_new[None, :, :])                        # (tj,tq,kv)
            l_tile = jnp.sum(jnp.sum(p, axis=0), axis=-1, keepdims=True)
            l_sc[h] = alpha * l_sc[h] + l_tile
            # sum_k p[i,j,k]*(v1[j](.)v2[k]) = v1[j] (.) (P_j @ V2)
            pv = jnp.dot(p.reshape(tj * tq, kv_len).astype(jnp.bfloat16),
                         v2_h, preferred_element_type=jnp.float32)
            pv = pv.reshape(tj, tq, dim_head)
            contrib = jnp.sum(pv * v1_h[:, None, :], axis=0)          # (tq,Dh)
            acc_sc[h] = alpha * acc_sc[h] + contrib
            m_sc[h] = m_new

    @pl.when(ji == pl.num_programs(2) - 1)
    def _():
        outs = [(acc_sc[h] * pl.reciprocal(l_sc[h], approx=True)
                 ).astype(jnp.bfloat16) for h in range(heads)]
        o_cat = jnp.concatenate(outs, axis=-1)
        o_ref[0] = jnp.dot(o_cat, wo_ref[...],
                           preferred_element_type=jnp.float32)


def two_simplicial_attention(q, k1, k2, v1, v2, wo_bf16, *, heads, dim_head,
                             tq_pref=128, tj_pref=16):
    B, N, inner = q.shape
    D = wo_bf16.shape[1]
    tq = _pick_tile(N, tq_pref)
    tj = _pick_tile(N, tj_pref)
    kern = functools.partial(_two_simplicial_kernel, heads=heads,
                             dim_head=dim_head, scale=dim_head ** -0.5,
                             tq=tq, tj=tj, kv_len=N)
    qspec = pl.BlockSpec((1, tq, inner), lambda b, i, j: (b, i, 0))
    jspec = pl.BlockSpec((1, tj, inner), lambda b, i, j: (b, j, 0))
    fullspec = pl.BlockSpec((1, N, inner), lambda b, i, j: (b, 0, 0))
    return pl.pallas_call(
        kern,
        out_shape=jax.ShapeDtypeStruct((B, N, D), jnp.float32),
        grid=(B, N // tq, N // tj),
        in_specs=[qspec, jspec, fullspec, jspec, fullspec,
                  pl.BlockSpec((inner, D), lambda b, i, j: (0, 0))],
        out_specs=pl.BlockSpec((1, tq, D), lambda b, i, j: (b, i, 0)),
        scratch_shapes=[pltpu.VMEM((heads, tq, 1), jnp.float32),
                        pltpu.VMEM((heads, tq, 1), jnp.float32),
                        pltpu.VMEM((heads, tq, dim_head), jnp.float32)],
        compiler_params=_cparams("parallel", "parallel", "arbitrary"),
    )(q, k1, k2, v1, v2, wo_bf16)


# --------------------------- model (glue) -----------------------------------

def init_params(key, *, num_tokens, dim, depth, max_seq_len, dim_head, heads,
                two_simplicial_attn_every):
    keys = jax.random.split(key, 3 + depth)

    def nrm(k, shape, std=0.02, dtype=jnp.float32):
        return (jax.random.normal(k, shape, dtype=jnp.float32) * std).astype(dtype)

    inner = heads * dim_head
    params = dict(
        token_emb=nrm(keys[0], (num_tokens, dim)),
        pos_emb=nrm(keys[1], (max_seq_len, dim)),
        to_logits=nrm(keys[2], (dim, num_tokens), dtype=jnp.bfloat16),
        final_norm=jnp.ones((dim,), jnp.float32),
        layers=[],
    )
    for i in range(depth):
        lk = jax.random.split(keys[3 + i], 4)
        simplicial = ((i + 1) % two_simplicial_attn_every) == 0
        n_proj = 5 if simplicial else 3               # q,k1,k2,v1,v2 vs q,k,v
        layer = dict(
            heads=heads, dim_head=dim_head, simplicial=simplicial,
            attn_norm=jnp.ones((dim,), jnp.float32),
            ff_norm=jnp.ones((dim,), jnp.float32),
            w_qkv=nrm(lk[0], (dim, n_proj * inner), dtype=jnp.bfloat16),
            wo=nrm(lk[1], (inner, dim), dtype=jnp.bfloat16),
            w1=nrm(lk[2], (dim, dim * 4), dtype=jnp.bfloat16),
            w2=nrm(lk[3], (dim * 4, dim), dtype=jnp.bfloat16),
        )
        params['layers'].append(layer)
    return params


def _attn_block(layer, x):
    B, N, D = x.shape
    H, Dh = layer['heads'], layer['dim_head']
    inner = H * Dh
    # one fused RMSNorm + all-projections matmul (bf16 out, lane-dense)
    proj = rmsnorm_matmul(x.reshape(B * N, D), layer['attn_norm'],
                          layer['w_qkv'], out_dtype=jnp.bfloat16)
    proj = proj.reshape(B, N, -1)
    n_proj = proj.shape[-1] // inner
    parts = [proj[:, :, p * inner:(p + 1) * inner] for p in range(n_proj)]
    if layer['simplicial']:
        q, k1, k2, v1, v2 = parts
        out = two_simplicial_attention(q, k1, k2, v1, v2, layer['wo'],
                                       heads=H, dim_head=Dh)
    else:
        q, k, v = parts
        out = causal_attention(q, k, v, layer['wo'], heads=H, dim_head=Dh)
    return out                                         # wo already applied


def _ff_block(layer, x):
    B, N, D = x.shape
    out = feedforward(x.reshape(B * N, D), layer['ff_norm'],
                      layer['w1'], layer['w2'])
    return out.reshape(B, N, D)


def forward(params, x_ids):
    """TwoSimplicialLM.forward(x, return_loss=False) -> logits (B, N, V)."""
    B, N = x_ids.shape
    tokens = params['token_emb'][x_ids]                # embedding gather (XLA)
    x = tokens + params['pos_emb'][:N][None]           # pos add (XLA, per review)
    for layer in params['layers']:
        x = x + _attn_block(layer, x)
        x = x + _ff_block(layer, x)
    x2d = x.reshape(B * N, -1)
    logits = rmsnorm_matmul(x2d, params['final_norm'], params['to_logits'],
                            out_dtype=jnp.float32)     # fused final norm + head
    return logits.reshape(B, N, -1)


# --------------------------- main -------------------------------------------

if __name__ == "__main__":
    key = jax.random.PRNGKey(0)
    pkey, xkey = jax.random.split(key)

    num_tokens, dim, depth = 256, 32, 4
    max_seq_len, dim_head, heads = 16, 16, 2
    two_simplicial_attn_every = 2

    params = init_params(pkey, num_tokens=num_tokens, dim=dim, depth=depth,
                         max_seq_len=max_seq_len, dim_head=dim_head,
                         heads=heads,
                         two_simplicial_attn_every=two_simplicial_attn_every)

    B, N = 2, 8
    x_ids = jax.random.randint(xkey, (B, N), 0, num_tokens, dtype=jnp.int32)

    logits = forward(params, x_ids)
    logits = jax.block_until_ready(logits)
    assert logits.shape == (B, N, num_tokens)
    assert bool(jnp.all(jnp.isfinite(logits)))
    print("KERNEL_OK")
</pallas_src>

<mosaic_0001>
module attributes {stable_mosaic.version = 11 : i64} {
  func.func @_rmsnorm_matmul_kernel(%arg0: i32, %arg1: i32, %arg2: memref<16x32xf32, #tpu.memory_space<vmem>>, %arg3: memref<1x32xf32, #tpu.memory_space<vmem>>, %arg4: memref<32x96xbf16, #tpu.memory_space<vmem>>, %arg5: memref<16x96xbf16, #tpu.memory_space<vmem>>) attributes {dimension_semantics = [#tpu.dimension_semantics<parallel>, #tpu.dimension_semantics<parallel>], iteration_bounds = array<i64: 1, 1>, scalar_prefetch = 0 : i64, scratch_operands = 0 : i64, tpu.core_type = #tpu.core_type<tc>, window_params = [{transform_indices = @transform_0, window_bounds = array<i64: 16, 32>}, {pipeline_mode = #tpu.pipeline_mode<synchronous>, transform_indices = @transform_1, window_bounds = array<i64: 1, 32>}, {transform_indices = @transform_2, window_bounds = array<i64: 32, 96>}, {transform_indices = @transform_3, window_bounds = array<i64: 16, 96>}]} {
    %c0 = arith.constant 0 : index
    %c0_0 = arith.constant 0 : index
    %0 = vector.load %arg2[%c0, %c0_0] : memref<16x32xf32, #tpu.memory_space<vmem>>, vector<16x32xf32>
    %1 = arith.mulf %0, %0 : vector<16x32xf32>
    %cst = arith.constant dense<0.000000e+00> : vector<16xf32>
    %2 = vector.multi_reduction <add>, %1, %cst [1] : vector<16x32xf32> to vector<16xf32>
    %3 = vector.shape_cast %2 : vector<16xf32> to vector<16x1xf32>
    %cst_1 = arith.constant 3.200000e+01 : f32
    %4 = vector.broadcast %cst_1 : f32 to vector<16x1xf32>
    %5 = arith.divf %3, %4 : vector<16x1xf32>
    %cst_2 = arith.constant 9.99999997E-7 : f32
    %6 = vector.broadcast %cst_2 : f32 to vector<16x1xf32>
    %7 = arith.addf %5, %6 : vector<16x1xf32>
    %8 = math.rsqrt %7 : vector<16x1xf32>
    %9 = vector.broadcast %8 : vector<16x1xf32> to vector<16x32xf32>
    %10 = arith.mulf %0, %9 : vector<16x32xf32>
    %c0_3 = arith.constant 0 : index
    %c0_4 = arith.constant 0 : index
    %11 = vector.load %arg3[%c0_3, %c0_4] : memref<1x32xf32, #tpu.memory_space<vmem>>, vector<1x32xf32>
    %12 = vector.broadcast %11 : vector<1x32xf32> to vector<16x32xf32>
    %13 = arith.mulf %10, %12 : vector<16x32xf32>
    %14 = arith.truncf %13 : vector<16x32xf32> to vector<16x32xbf16>
    %c0_5 = arith.constant 0 : index
    %c0_6 = arith.constant 0 : index
    %15 = vector.load %arg4[%c0_5, %c0_6] : memref<32x96xbf16, #tpu.memory_space<vmem>>, vector<32x96xbf16>
    %cst_7 = arith.constant dense<0.000000e+00> : vector<16x96xf32>
    %16 = tpu.matmul %14, %15, %cst_7 {dimension_numbers = #tpu.dot_dimension_numbers<[1], [0], [0], [1], [0, 0, 1, 1], [], []>} : vector<16x32xbf16>, vector<32x96xbf16>, vector<16x96xf32> -> vector<16x96xf32>
    %17 = arith.truncf %16 : vector<16x96xf32> to vector<16x96xbf16>
    %c0_8 = arith.constant 0 : index
    %c0_9 = arith.constant 0 : index
    %18 = vector.load %arg5[%c0_8, %c0_9] : memref<16x96xbf16, #tpu.memory_space<vmem>>, vector<16x96xbf16>
    tpu.vector_store %arg5[%c0_8, %c0_9], %17 {strides = array<i32>} : memref<16x96xbf16, #tpu.memory_space<vmem>>, vector<16x96xbf16>,
    return
  }
  func.func @transform_0(%arg0: i32, %arg1: i32) -> (i32, i32) {
    %c0_i32 = arith.constant 0 : i32
    %c0_i32_0 = arith.constant 0 : i32
    return %arg0, %c0_i32 : i32, i32
  }
  func.func @transform_1(%arg0: i32, %arg1: i32) -> (i32, i32) {
    %c0_i32 = arith.constant 0 : i32
    %c0_i32_0 = arith.constant 0 : i32
    %c0_i32_1 = arith.constant 0 : i32
    return %c0_i32, %c0_i32_0 : i32, i32
  }
  func.func @transform_2(%arg0: i32, %arg1: i32) -> (i32, i32) {
    %c0_i32 = arith.constant 0 : i32
    %c0_i32_0 = arith.constant 0 : i32
    return %c0_i32, %arg1 : i32, i32
  }
  func.func @transform_3(%arg0: i32, %arg1: i32) -> (i32, i32) {
    %c0_i32 = arith.constant 0 : i32
    return %arg0, %arg1 : i32, i32
  }
}

</mosaic_0001>

<bundles_post_ra>
// kernel: tpu_custom_call.1
= control target key start
LH: loop header
LB: loop body
LE: loop exit
PB: predicated region body
PF: predicated region fallthrough
CT: control target
= control target key end

     0   :  { %8 = vsyncpa [#allocation3], 0  ;;  %s313_s0 = inlined_call_operand.hbm [shape: f32[16,32], index: 0, kind: input, shape index: {}]   ;;  %s314_s1 = inlined_call_operand.vmem [shape: f32[1,32], index: 1, kind: input, shape index: {}]   ;;  %s315_s2 = inlined_call_operand.hbm [shape: bf16[32,96], index: 2, kind: input, shape index: {}]   ;;  %s316_s3 = inlined_call_operand.hbm [shape: bf16[16,96], index: 3, kind: output, shape index: {}]  }
   0x1   :  { %9 = vsyncpa [#allocation6], 0 }
   0x2   :  { %10 = vsyncpa [#allocation4], 0  ;;  %s263_s12 = smov [#allocation2]  }
   0x3   :  { %s16_s13 = sshll.u32 %s263_s12, 4  ;;  %s17_s13 = int_to_ptr.vmem [resolvable:$true] %s16_s13 }
   0x4   :  { %s205_s14 = scalar_lea.vmem %s17_s13, 256  ;;  %p210_p1 = scmp.lt.s32.totalorder %s17_s13, %s17_s13 }
   0x5   :  { %p206_p0 = scmp.ne.s32.totalorder %s17_s13, %s205_s14  ;;  %p211_p2 = scmp.lt.s32.totalorder %s205_s14, %s205_s14 }
   0x7   :  { %p212_p3 = por %p211_p2, %p210_p1 }
   0x9   :  { %p213_p4 = pnand %p212_p3, %p206_p0 }
   0xb   :  { %216 = shalt.err (!%p213_p4)
}
   0xc   :  { %s264_s15 = smov 128   ;;  %s265_s16 = smov 8  }
   0xd   :  { %22 = dma.hbm_to_vmem [thread:$0]  %s313_s0, 256, %s17_s13, [#allocation3], %s264_s15, %s264_s15, %s265_s16  }
   0xe   :  { %s266_s19 = smov [#allocation5]  }
   0xf   :  { %s30_s20 = sshll.u32 %s266_s19, 4  ;;  %s31_s20 = int_to_ptr.vmem [resolvable:$true] %s30_s20 }
  0x10   :  { %s225_s21 = scalar_lea.vmem %s31_s20, 256  ;;  %p230_p6 = scmp.lt.s32.totalorder %s31_s20, %s31_s20 }
  0x11   :  { %p226_p5 = scmp.ne.s32.totalorder %s31_s20, %s225_s21  ;;  %p231_p7 = scmp.lt.s32.totalorder %s225_s21, %s225_s21 }
  0x13   :  { %p232_p8 = por %p231_p7, %p230_p6 }
  0x15   :  { %p233_p9 = pnand %p232_p8, %p226_p5 }
  0x17   :  { %236 = shalt.err (!%p233_p9)
}
  0x18   :  { %s267_s22 = smov 64   ;;  %s268_s23 = smov 4  }
  0x19   :  { %36 = dma.hbm_to_vmem [thread:$0]  %s315_s2, 256, %s31_s20, [#allocation6], %s267_s22, %s267_s22, %s268_s23  }
  0x1a   :  { %257 = dma.done.wait [#allocation3], 256  }
  0x1b   :  { %258 = vsyncadd [#allocation3], 4294967040 }
  0x1c   :  { %259 = dma.done.wait [#allocation6], 256  }
  0x1d   :  { %260 = vsyncadd [#allocation6], 4294967040  ;;  %v44_v0 = vld [vmem:[#allocation2] sm:$0xff]  ;;  %vm48_vm0 = vcmask 261120   ;;  %v45_v1 = vld [vmem:[#allocation2 + $0x8] sm:$0xff]  ;;  %v269_v7 = vmov 0.0  }
  0x1e   :  { %v46_v2 = vmul.f32 %v44_v0, %v44_v0  ;;  %v47_v3 = vmul.f32 %v45_v1, %v45_v1  ;;  %v191_v6 = vld [vmem:[#allocation5 + $0x8] sm:$0xff]   ;;  %174 = vmatprep.subr.bf16.mxu0 %v269_v7  ;;  %vm270_vm1 = vmmov 0   ;;  %v192_v8 = vld [vmem:[#allocation5] sm:$0xff]   ;;  %v163_v18 = vld [vmem:[%s314_s1] ss:$0 sm:$0xff]  ;;  %vm142_vm2 = vcmask 781312  }
  0x1f   :  { %178 = vmatprep.mubr.msk.bf16.mxu0 %vm270_vm1, %v269_v7  ;;  %175 = vmatpush3.bf16.msra.mxu0 %v191_v6  ;;  %s271_s26 = smov [#allocation7]  }
  0x20   :  { %v49_v4 = vsel %vm48_vm0, %v46_v2, 0.0  ;;  %v52_v5 = vsel %vm48_vm0, %v47_v3, 0.0  ;;  %176 = vmatprep.subr.bf16.mxu0 %v269_v7  ;;  %s150_s27 = sshll.u32 %s271_s26, 4  ;;  %s151_s27 = int_to_ptr.vmem [resolvable:$true] %s150_s27 }
  0x21   :  { %50 = vadd.xlane.f32.xlu0 %v49_v4  ;;  %s237_s28 = scalar_lea.vmem %s151_s27, 128  ;;  %p242_p11 = scmp.lt.s32.totalorder %s151_s27, %s151_s27 }
  0x22   :  { %p238_p10 = scmp.ne.s32.totalorder %s151_s27, %s237_s28  ;;  %p243_p12 = scmp.lt.s32.totalorder %s237_s28, %s237_s28 }
  0x23   :  { %177 = vmatpush3.bf16.msra.mxu0 %v192_v8 }
  0x24   :  { %p244_p13 = por %p243_p12, %p242_p11 }
  0x25   :  { %53 = vadd.xlane.f32.xlu0 %v52_v5 }
  0x26   :  { %p245_p0 = pnand %p244_p13, %p238_p10 }
  0xaa   :  { %v51_v9 = vpop.xlane.xlu0 %50 }
  0xab   :  { %v56_v10 = vmul.f32 0.03125, %v51_v9 }
  0xad   :  { %v58_v11 = vadd.f32 1e-06, %v56_v10 }
  0xae   :  { %v54_v12 = vpop.xlane.xlu0 %53 }
  0xaf   :  { %193 = vrsqrt.f32 %v58_v11  ;;  %v57_v13 = vmul.f32 0.03125, %v54_v12 }
  0xb1   :  { %v59_v14 = vadd.f32 1e-06, %v57_v13 }
  0xb3   :  { %195 = vrsqrt.f32 %v59_v14 }
  0xbc   :  { %v194_v15 = vpop.eup %193 }
  0xbd   :  { %v62_v16 = vmul.f32 %v194_v15, %v44_v0 }
  0xbf   :  { %v71_v20 = vmul.f32 %v163_v18, %v62_v16 }
  0xc0   :  { %v196_v17 = vpop.eup %195 }
  0xc1   :  { %v63_v19 = vmul.f32 %v196_v17, %v45_v1 }
  0xc3   :  { %v72_v21 = vmul.f32 %v163_v18, %v63_v19 }
  0xc5   :  { %v73_v22 = vpack.c.bf16 %v72_v21, %v71_v20 }
  0xc7   :  { %179 = vmatmul.mubr.msk.bf16.vlgmr.msra.gmra.mxu0 %vm48_vm0, %v73_v22 }
 0x187   :  { %v127_v23 = vpop.f32.mrf.mxu0 }
 0x188   :  { %v169_v24 = vpack.c.bf16 %v127_v23, %v127_v23 }
 0x189   :  { %v180_v25 = vpop.f32.mrf.mxu0 }
 0x18a   :  { %143 = vst.msk [vmem:[#allocation7] sm:$0xf] %vm142_vm2, %v169_v24 }
 0x18b   :  { %v130_v26 = vpop.f32.mrf.mxu0 }
 0x18c   :  { %v170_v27 = vpack.c.bf16 %v130_v26, %v130_v26 }
 0x18d   :  { %v181_v28 = vpop.f32.mrf.mxu0 }
 0x18e   :  { %144 = vst.msk [vmem:[#allocation7 + $0x4] sm:$0xf] %vm142_vm2, %v170_v27 }
 0x18f   :  { %248 = shalt.err (!%p245_p0)
}
 0x190   :  { %156 = dma.vmem_to_hbm [thread:$0]  %s151_s27, 128, %s316_s3, [#allocation4], %s267_s22, %s267_s22, %s268_s23  }
 0x191   :  { %261 = dma.done.wait [#allocation4], 128  }
 0x192   :  { %262 = vsyncadd [#allocation4], 4294967168 }
 0x193   :  { %160 = vsyncpa [#allocation3], 1 }
 0x194   :  { %161 = vsyncpa [#allocation6], 1 }
 0x195   :  { %162 = vsyncpa [#allocation4], 1 }

</bundles_post_ra>
